<compile_context>
chip_gen: v6e
topology: v6e:2x2x1
jax: 0.10.0
libtpu: 0.0.40
codegen_flags: <defaults>
</compile_context>

<pallas_src>
import functools
import math

import jax
import jax.numpy as jnp
from jax.experimental import pallas as pl
from jax.experimental.pallas import tpu as pltpu


# ----------------------------------------------------------------------------
# Kernel: per-row layer norm over the last axis of a (tm, D) tile.
# ----------------------------------------------------------------------------
def _layernorm_kernel(x_ref, alpha_ref, bias_ref, o_ref, *, d, eps):
    x = x_ref[...].astype(jnp.float32)                    # (tm, D)

    mean = jnp.mean(x, axis=-1, keepdims=True)            # (tm, 1)
    xc = x - mean
    # torch.std default is the unbiased estimator: divide by (D - 1).
    var = jnp.sum(xc * xc, axis=-1, keepdims=True) * (1.0 / (d - 1))
    std = jnp.sqrt(var)

    inv = pl.reciprocal(std + eps, approx=False)          # exact 1/(std+eps)
    alpha = alpha_ref[0]                                  # scalar from SMEM
    bias = bias_ref[0]                                    # scalar from SMEM

    y = alpha * (xc * inv) + bias
    o_ref[...] = y.astype(o_ref.dtype)


# ----------------------------------------------------------------------------
# Row-tile size: biggest tile that keeps VMEM use modest (double-buffered
# in + out), rounded to the sublane multiple of 8.  Full-extent blocks are
# always legal, so small N just uses the whole array.
# ----------------------------------------------------------------------------
def _choose_block_rows(n, d, itemsize, target_bytes=2 * 1024 * 1024,
                       max_rows=1024):
    rows = target_bytes // max(1, d * itemsize)
    rows = max(8, min(max_rows, rows))
    rows = (rows // 8) * 8
    if n <= rows:
        return n                     # full extent -> no (8,128) constraint
    return rows


# ----------------------------------------------------------------------------
# Wrapper: flatten leading dims, tile over rows, keep the full hidden dim per
# block (the reduction axis must never be split across blocks).
# ----------------------------------------------------------------------------
def layer_norm(x, alpha, bias, eps=1e-6, *, block_rows=None):
    orig_shape = x.shape
    d = orig_shape[-1]
    n = math.prod(orig_shape[:-1])
    x2 = x.reshape(n, d)

    if block_rows is None:
        tm = _choose_block_rows(n, d, jnp.dtype(x.dtype).itemsize)
    else:
        tm = n if n <= block_rows else block_rows
    grid = (pl.cdiv(n, tm),)

    kern = functools.partial(_layernorm_kernel, d=d, eps=eps)

    out = pl.pallas_call(
        kern,
        out_shape=jax.ShapeDtypeStruct((n, d), x.dtype),
        grid_spec=pltpu.PrefetchScalarGridSpec(
            num_scalar_prefetch=0,
            grid=grid,
            in_specs=[
                pl.BlockSpec((tm, d), lambda i: (i, 0)),
                pl.BlockSpec(memory_space=pltpu.MemorySpace.SMEM),   # alpha (1,)
                pl.BlockSpec(memory_space=pltpu.MemorySpace.SMEM),   # bias  (1,)
            ],
            out_specs=pl.BlockSpec((tm, d), lambda i: (i, 0)),
        ),
        compiler_params=pltpu.CompilerParams(
            dimension_semantics=("parallel",)),
    )(x2, alpha, bias)

    return out.reshape(orig_shape)


# ----------------------------------------------------------------------------
# Module-like wrapper mirroring the PyTorch class.
# ----------------------------------------------------------------------------
class LayerNormalizationPallas:
    def __init__(self, eps=1e-6):
        self.alpha = jnp.ones((1,), jnp.float32)   # nn.Parameter(torch.ones(1))
        self.bias = jnp.zeros((1,), jnp.float32)   # nn.Parameter(torch.zeros(1))
        self.eps = eps

    def __call__(self, x, **kw):
        return layer_norm(x, self.alpha, self.bias, self.eps, **kw)


# ----------------------------------------------------------------------------
# Pure-jnp reference (torch semantics: unbiased std, std + eps in denominator).
# ----------------------------------------------------------------------------
def reference_forward(x, alpha, bias, eps=1e-6):
    mean = jnp.mean(x, axis=-1, keepdims=True)
    std = jnp.std(x, axis=-1, keepdims=True, ddof=1)
    return alpha * (x - mean) / (std + eps) + bias


if __name__ == "__main__":
    key = jax.random.PRNGKey(0)
    k1, k2, k3 = jax.random.split(key, 3)

    ln = LayerNormalizationPallas(eps=1e-6)

    # Small shape consistent with the module: (batch=2, seq=8, hidden=32).
    x_small = jax.random.normal(k1, (2, 8, 32), jnp.float32)
    out_small = jax.block_until_ready(ln(x_small))
    ref_small = reference_forward(x_small, ln.alpha, ln.bias, ln.eps)
    assert out_small.shape == x_small.shape
    assert jnp.allclose(out_small, ref_small, atol=1e-5, rtol=1e-5), \
        "small-shape mismatch vs reference"

    # Larger shape to exercise the multi-tile (grid > 1), adaptive-tm path.
    x_big = jax.random.normal(k2, (4, 512, 128), jnp.float32)   # 2048 rows
    out_big = jax.block_until_ready(ln(x_big))
    ref_big = reference_forward(x_big, ln.alpha, ln.bias, ln.eps)
    assert jnp.allclose(out_big, ref_big, atol=1e-5, rtol=1e-5), \
        "tiled-shape mismatch vs reference"

    # Ragged row count with a forced small tile -> exercises the partial
    # (masked) last block.
    x_rag = jax.random.normal(k3, (2, 100, 32), jnp.float32)    # 200 rows
    out_rag = jax.block_until_ready(ln(x_rag, block_rows=64))   # 4 tiles, last=8
    ref_rag = reference_forward(x_rag, ln.alpha, ln.bias, ln.eps)
    assert jnp.allclose(out_rag, ref_rag, atol=1e-5, rtol=1e-5), \
        "ragged-shape mismatch vs reference"

    print("KERNEL_OK")
</pallas_src>

<mosaic_0001>
module attributes {stable_mosaic.version = 11 : i64} {
  func.func @_layernorm_kernel(%arg0: i32, %arg1: memref<16x32xf32, #tpu.memory_space<vmem>>, %arg2: memref<1xf32, #tpu.memory_space<smem>>, %arg3: memref<1xf32, #tpu.memory_space<smem>>, %arg4: memref<16x32xf32, #tpu.memory_space<vmem>>) attributes {dimension_semantics = [#tpu.dimension_semantics<parallel>], iteration_bounds = array<i64: 1>, scalar_prefetch = 0 : i64, scratch_operands = 0 : i64, tpu.core_type = #tpu.core_type<tc>, window_params = [{transform_indices = @transform_0, window_bounds = array<i64: 16, 32>}, {transform_indices = @transform_1, window_bounds = array<i64: 1>}, {transform_indices = @transform_2, window_bounds = array<i64: 1>}, {transform_indices = @transform_3, window_bounds = array<i64: 16, 32>}]} {
    %c0 = arith.constant 0 : index
    %c0_0 = arith.constant 0 : index
    %0 = vector.load %arg1[%c0, %c0_0] : memref<16x32xf32, #tpu.memory_space<vmem>>, vector<16x32xf32>
    %cst = arith.constant dense<0.000000e+00> : vector<16xf32>
    %1 = vector.multi_reduction <add>, %0, %cst [1] : vector<16x32xf32> to vector<16xf32>
    %2 = vector.shape_cast %1 : vector<16xf32> to vector<16x1xf32>
    %cst_1 = arith.constant 3.200000e+01 : f32
    %3 = vector.broadcast %cst_1 : f32 to vector<16x1xf32>
    %4 = arith.divf %2, %3 : vector<16x1xf32>
    %5 = vector.broadcast %4 : vector<16x1xf32> to vector<16x32xf32>
    %6 = arith.subf %0, %5 : vector<16x32xf32>
    %7 = arith.mulf %6, %6 : vector<16x32xf32>
    %cst_2 = arith.constant dense<0.000000e+00> : vector<16xf32>
    %8 = vector.multi_reduction <add>, %7, %cst_2 [1] : vector<16x32xf32> to vector<16xf32>
    %9 = vector.shape_cast %8 : vector<16xf32> to vector<16x1xf32>
    %cst_3 = arith.constant 0.0322580636 : f32
    %10 = vector.broadcast %cst_3 : f32 to vector<16x1xf32>
    %11 = arith.mulf %9, %10 : vector<16x1xf32>
    %12 = math.sqrt %11 : vector<16x1xf32>
    %cst_4 = arith.constant 9.99999997E-7 : f32
    %13 = vector.broadcast %cst_4 : f32 to vector<16x1xf32>
    %14 = arith.addf %12, %13 : vector<16x1xf32>
    %15 = tpu.reciprocal %14 : vector<16x1xf32> -> vector<16x1xf32>
    %c0_5 = arith.constant 0 : index
    %16 = memref.load %arg2[%c0_5] : memref<1xf32, #tpu.memory_space<smem>>
    %c0_6 = arith.constant 0 : index
    %17 = memref.load %arg3[%c0_6] : memref<1xf32, #tpu.memory_space<smem>>
    %18 = vector.broadcast %15 : vector<16x1xf32> to vector<16x32xf32>
    %19 = arith.mulf %6, %18 : vector<16x32xf32>
    %20 = vector.broadcast %16 : f32 to vector<16x32xf32>
    %21 = arith.mulf %20, %19 : vector<16x32xf32>
    %22 = vector.broadcast %17 : f32 to vector<16x32xf32>
    %23 = arith.addf %21, %22 : vector<16x32xf32>
    %c0_7 = arith.constant 0 : index
    %c0_8 = arith.constant 0 : index
    %24 = vector.load %arg4[%c0_7, %c0_8] : memref<16x32xf32, #tpu.memory_space<vmem>>, vector<16x32xf32>
    tpu.vector_store %arg4[%c0_7, %c0_8], %23 {strides = array<i32>} : memref<16x32xf32, #tpu.memory_space<vmem>>, vector<16x32xf32>,
    return
  }
  func.func @transform_0(%arg0: i32) -> (i32, i32) {
    %c0_i32 = arith.constant 0 : i32
    %c0_i32_0 = arith.constant 0 : i32
    return %arg0, %c0_i32 : i32, i32
  }
  func.func @transform_1(%arg0: i32) -> i32 {
    %c0_i32 = arith.constant 0 : i32
    %c0_i32_0 = arith.constant 0 : i32
    return %c0_i32 : i32
  }
  func.func @transform_2(%arg0: i32) -> i32 {
    %c0_i32 = arith.constant 0 : i32
    %c0_i32_0 = arith.constant 0 : i32
    return %c0_i32 : i32
  }
  func.func @transform_3(%arg0: i32) -> (i32, i32) {
    %c0_i32 = arith.constant 0 : i32
    %c0_i32_0 = arith.constant 0 : i32
    return %arg0, %c0_i32 : i32, i32
  }
}

</mosaic_0001>

<bundles_post_ra>
// kernel: tpu_custom_call.1
= control target key start
LH: loop header
LB: loop body
LE: loop exit
PB: predicated region body
PF: predicated region fallthrough
CT: control target
= control target key end

     0   :  { %10 = vsyncpa [#allocation5], 0  ;;  %s206_s0 = inlined_call_operand.hbm [shape: f32[16,32], index: 0, kind: input, shape index: {}]   ;;  %s207_s1 = inlined_call_operand.<no memory space> [shape: f32[1], index: 1, kind: input, shape index: {}]   ;;  %s208_s2 = inlined_call_operand.<no memory space> [shape: f32[1], index: 2, kind: input, shape index: {}]   ;;  %s209_s3 = inlined_call_operand.hbm [shape: f32[16,32], index: 3, kind: output, shape index: {}]  }
   0x1   :  { %11 = vsyncpa [#allocation6], 0  ;;  %s158_s12 = smov [#allocation4]  }
   0x2   :  { %s17_s13 = sshll.u32 %s158_s12, 4  ;;  %s18_s13 = int_to_ptr.vmem [resolvable:$true] %s17_s13 }
   0x3   :  { %s122_s14 = scalar_lea.vmem %s18_s13, 256  ;;  %p127_p1 = scmp.lt.s32.totalorder %s18_s13, %s18_s13 }
   0x4   :  { %p123_p0 = scmp.ne.s32.totalorder %s18_s13, %s122_s14  ;;  %p128_p2 = scmp.lt.s32.totalorder %s122_s14, %s122_s14 }
   0x6   :  { %p129_p3 = por %p128_p2, %p127_p1 }
   0x8   :  { %p130_p4 = pnand %p129_p3, %p123_p0 }
   0xa   :  { %133 = shalt.err (!%p130_p4)
}
   0xb   :  { %s159_s15 = smov 128   ;;  %s160_s16 = smov 8  }
   0xc   :  { %23 = dma.hbm_to_vmem [thread:$0]  %s206_s0, 256, %s18_s13, [#allocation5], %s159_s15, %s159_s15, %s160_s16  }
   0xd   :  { %154 = dma.done.wait [#allocation5], 256  }
   0xe   :  { %155 = vsyncadd [#allocation5], 4294967040  ;;  %vm33_vm0 = vcmask 261120   ;;  %v31_v0 = vld [vmem:[#allocation4] sm:$0xff]  ;;  %v32_v1 = vld [vmem:[#allocation4 + $0x8] sm:$0xff]  ;;  %v77_v31 = vstv %s207_s1  ;;  %v80_v33 = vstv %s208_s2  ;;  %s161_s22 = smov [#allocation7]  }
   0xf   :  { %v34_v2 = vsel %vm33_vm0, %v31_v0, 0.0  ;;  %v37_v3 = vsel %vm33_vm0, %v32_v1, 0.0  ;;  %s90_s23 = sshll.u32 %s161_s22, 4  ;;  %s91_s23 = int_to_ptr.vmem [resolvable:$true] %s90_s23 }
  0x10   :  { %35 = vadd.xlane.f32.xlu0 %v34_v2  ;;  %s134_s24 = scalar_lea.vmem %s91_s23, 256  ;;  %p139_p6 = scmp.lt.s32.totalorder %s91_s23, %s91_s23 }
  0x11   :  { %p135_p5 = scmp.ne.s32.totalorder %s91_s23, %s134_s24  ;;  %p140_p7 = scmp.lt.s32.totalorder %s134_s24, %s134_s24 }
  0x13   :  { %p141_p8 = por %p140_p7, %p139_p6 }
  0x14   :  { %38 = vadd.xlane.f32.xlu0 %v37_v3 }
  0x15   :  { %p142_p9 = pnand %p141_p8, %p135_p5 }
  0x99   :  { %v36_v4 = vpop.xlane.xlu0 %35 }
  0x9a   :  { %v41_v5 = vmul.f32 0.03125, %v36_v4 }
  0x9c   :  { %v43_v6 = vsub.f32 %v31_v0, %v41_v5 }
  0x9d   :  { %v39_v7 = vpop.xlane.xlu0 %38 }
  0x9e   :  { %v42_v8 = vmul.f32 0.03125, %v39_v7  ;;  %v45_v9 = vmul.f32 %v43_v6, %v43_v6 }
  0xa0   :  { %v44_v10 = vsub.f32 %v32_v1, %v42_v8  ;;  %v47_v11 = vsel %vm33_vm0, %v45_v9, 0.0 }
  0xa1   :  { %48 = vadd.xlane.f32.xlu1 %v47_v11 }
  0xa2   :  { %v46_v12 = vmul.f32 %v44_v10, %v44_v10 }
  0xa4   :  { %v50_v13 = vsel %vm33_vm0, %v46_v12, 0.0 }
  0xa5   :  { %51 = vadd.xlane.f32.xlu1 %v50_v13 }
 0x12a   :  { %v49_v14 = vpop.xlane.xlu1 %48 }
 0x12b   :  { %v53_v15 = vmul.f32 0.032258064, %v49_v14 }
 0x12d   :  { %106 = vrsqrt.f32 %v53_v15  ;;  %vm57_vm1 = vcmp.eq.f32.partialorder %v53_v15, inf  ;;  %v60_v20 = vand.u32 2147483648, %v53_v15  ;;  %vm59_vm2 = vcmp.eq.f32.partialorder %v53_v15, 0.0 }
 0x12e   :  { %v52_v16 = vpop.xlane.xlu1 %51 }
 0x12f   :  { %v54_v17 = vmul.f32 0.032258064, %v52_v16 }
 0x131   :  { %108 = vrsqrt.f32 %v54_v17  ;;  %vm64_vm3 = vcmp.eq.f32.partialorder %v54_v17, inf  ;;  %v67_v26 = vand.u32 2147483648, %v54_v17  ;;  %vm66_vm4 = vcmp.eq.f32.partialorder %v54_v17, 0.0 }
 0x13a   :  { %v107_v18 = vpop.eup %106 }
 0x13b   :  { %v56_v19 = vmul.f32 %v107_v18, %v53_v15 }
 0x13d   :  { %v58_v21 = vsel %vm57_vm1, %v53_v15, %v56_v19 }
 0x13e   :  { %v109_v22 = vpop.eup %108  ;;  %v61_v23 = vsel %vm59_vm2, %v60_v20, %v58_v21 }
 0x13f   :  { %v69_v24 = vadd.f32 1e-06, %v61_v23  ;;  %v63_v25 = vmul.f32 %v109_v22, %v54_v17 }
 0x141   :  { %110 = vrcp.f32 %v69_v24  ;;  %v65_v27 = vsel %vm64_vm3, %v54_v17, %v63_v25 }
 0x142   :  { %v68_v28 = vsel %vm66_vm4, %v67_v26, %v65_v27 }
 0x143   :  { %v70_v29 = vadd.f32 1e-06, %v68_v28 }
 0x145   :  { %112 = vrcp.f32 %v70_v29 }
 0x14e   :  { %v111_v30 = vpop.eup %110 }
 0x14f   :  { %v75_v32 = vmul.f32 %v111_v30, %v43_v6 }
 0x151   :  { %v78_v34 = vmul.f32 %v77_v31, %v75_v32 }
 0x152   :  { %v113_v35 = vpop.eup %112 }
 0x153   :  { %v76_v36 = vmul.f32 %v113_v35, %v44_v10  ;;  %v81_v37 = vadd.f32 %v80_v33, %v78_v34 }
 0x155   :  { %v79_v38 = vmul.f32 %v77_v31, %v76_v36  ;;  %83 = vst.msk [vmem:[#allocation7] sm:$0xff] %vm33_vm0, %v81_v37 }
 0x157   :  { %v82_v39 = vadd.f32 %v80_v33, %v79_v38 }
 0x159   :  { %84 = vst.msk [vmem:[#allocation7 + $0x8] sm:$0xff] %vm33_vm0, %v82_v39 }
 0x15a   :  { %145 = shalt.err (!%p142_p9)
}
 0x15b   :  { %96 = dma.vmem_to_hbm [thread:$0]  %s91_s23, 256, %s209_s3, [#allocation6], %s159_s15, %s159_s15, %s160_s16  }
 0x15c   :  { %156 = dma.done.wait [#allocation6], 256  }
 0x15d   :  { %157 = vsyncadd [#allocation6], 4294967040 }
 0x15e   :  { %100 = vsyncpa [#allocation5], 1 }
 0x15f   :  { %101 = vsyncpa [#allocation6], 1 }

</bundles_post_ra>
